<compile_context>
chip_gen: v6e
topology: v6e:2x2x1
jax: 0.10.0
libtpu: 0.0.40
codegen_flags: <defaults>
</compile_context>

<pallas_src>
import functools

import jax
import jax.numpy as jnp
from jax.experimental import pallas as pl
from jax.experimental.pallas import tpu as pltpu

HIDDEN = 256
SUBLANE = 8


def _round_up(x, m):
    return ((x + m - 1) // m) * m


def _eup_has_bf16():
    """True on TPU generations with a bf16 VPU/EUP datapath (v6e, v7x)."""
    try:
        kind = jax.devices()[0].device_kind.lower()
    except Exception:
        return False
    # <= v5 (v2/v3/v4/v5e/v5p) have no bf16 transcendental path.
    return not any(g in kind for g in ("v2", "v3", "v4", "v5"))


def _state_projector_kernel(x_ref, w1_ref, b1_ref, w2_ref, b2_ref,
                            w3_ref, b3_ref, o_ref, *, tanh_dtype):
    # Fused MXU + VPU/EUP pass per (tile_m, K) block of x:
    #   matmul -> bias -> tanh -> matmul -> bias -> tanh -> matmul -> bias.
    # Matmul inputs are bf16 (weight dtype), accumulation/bias stay f32,
    # tanh runs in `tanh_dtype` (bf16 on v6e/v7x, f32 on v5e).
    cd = w1_ref.dtype
    x = x_ref[...].astype(cd)

    h1 = jnp.dot(x, w1_ref[...], preferred_element_type=jnp.float32) + b1_ref[...]
    h1 = jnp.tanh(h1.astype(tanh_dtype)).astype(cd)

    h2 = jnp.dot(h1, w2_ref[...], preferred_element_type=jnp.float32) + b2_ref[...]
    h2 = jnp.tanh(h2.astype(tanh_dtype)).astype(cd)

    out = jnp.dot(h2, w3_ref[...], preferred_element_type=jnp.float32) + b3_ref[...]
    o_ref[...] = out.astype(o_ref.dtype)


def state_projector_forward(state, params, n_seq, *,
                            tile_m_max=1024, tanh_in_bf16=None):
    """state: (batch, seq_len, feat) with seq_len == n_seq. Returns (batch, out_size) f32."""
    batch, seq_len, feat = state.shape
    assert seq_len == n_seq
    input_dim = feat * n_seq
    x = state.reshape(batch, input_dim)  # row-major view, matches torch .reshape

    w1, b1, w2, b2, w3, b3 = params
    hidden = w1.shape[1]
    out_size = w3.shape[1]

    if tanh_in_bf16 is None:
        tanh_in_bf16 = _eup_has_bf16()
    tanh_dtype = jnp.bfloat16 if tanh_in_bf16 else jnp.float32

    # ---- row tiling: no K/N/M padding; partial edge block handled by Pallas ----
    if batch <= SUBLANE:
        tile_m = batch  # block dim == full array dim -> always legal
    else:
        # aim for >= 2 grid steps so both v7x TensorCores get work,
        # but cap the tile to amortize per-step overhead without VMEM blowup.
        tile_m = min(tile_m_max, _round_up(pl.cdiv(batch, 2), SUBLANE))
    grid_m = pl.cdiv(batch, tile_m)

    # Weights/biases: constant index_map -> resident in VMEM across grid steps.
    resident = lambda shape: pl.BlockSpec(shape, lambda i: (0, 0))

    flops = 2 * batch * (input_dim * hidden + hidden * hidden + hidden * out_size)
    transcendentals = 2 * batch * hidden
    bytes_accessed = int(
        batch * input_dim * x.dtype.itemsize      # x read
        + batch * out_size * 4                    # output write
        + sum(int(a.size) * a.dtype.itemsize for a in params))  # weights (once)

    kernel = functools.partial(_state_projector_kernel, tanh_dtype=tanh_dtype)

    out = pl.pallas_call(
        kernel,
        out_shape=jax.ShapeDtypeStruct((batch, out_size), jnp.float32),
        grid=(grid_m,),
        in_specs=[
            pl.BlockSpec((tile_m, input_dim), lambda i: (i, 0)),  # x rows stream
            resident(w1.shape), resident(b1.shape),
            resident(w2.shape), resident(b2.shape),
            resident(w3.shape), resident(b3.shape),
        ],
        out_specs=pl.BlockSpec((tile_m, out_size), lambda i: (i, 0)),
        compiler_params=pltpu.CompilerParams(
            dimension_semantics=("parallel",)),
        cost_estimate=pl.CostEstimate(
            flops=flops,
            transcendentals=transcendentals,
            bytes_accessed=bytes_accessed),
    )(x, w1, b1, w2, b2, w3, b3)

    return out


def init_params(key, input_dim, out_size, hidden=HIDDEN,
                weight_dtype=jnp.bfloat16):
    # One-time prep: weights stored (in, out) in bf16 (no per-forward pad/cast
    # ops), biases (1, out) in f32.  PyTorch-like uniform init bounds.
    def linear(k, fan_in, fan_out):
        kw, kb = jax.random.split(k)
        bound = 1.0 / jnp.sqrt(fan_in)
        w = jax.random.uniform(kw, (fan_in, fan_out), jnp.float32, -bound, bound)
        b = jax.random.uniform(kb, (1, fan_out), jnp.float32, -bound, bound)
        return w.astype(weight_dtype), b

    k1, k2, k3 = jax.random.split(key, 3)
    w1, b1 = linear(k1, input_dim, hidden)
    w2, b2 = linear(k2, hidden, hidden)
    w3, b3 = linear(k3, hidden, out_size)
    return (w1, b1, w2, b2, w3, b3)


def reference_forward(state, params, n_seq, *, tanh_dtype=jnp.float32):
    # Pure-JAX reference with the SAME bf16-input / f32-accumulate contract
    # (and, optionally, the same tanh dtype as the kernel).
    batch = state.shape[0]
    x = state.reshape(batch, -1).astype(jnp.float32)
    w1, b1, w2, b2, w3, b3 = params
    cd = w1.dtype
    h1 = jnp.dot(x.astype(cd), w1, preferred_element_type=jnp.float32) + b1
    h1 = jnp.tanh(h1.astype(tanh_dtype)).astype(cd)
    h2 = jnp.dot(h1, w2, preferred_element_type=jnp.float32) + b2
    h2 = jnp.tanh(h2.astype(tanh_dtype)).astype(cd)
    return jnp.dot(h2, w3, preferred_element_type=jnp.float32) + b3


if __name__ == "__main__":
    # Small shapes consistent with the module: batch=2, n_seq=8, per-step feat=4
    # -> flattened input_dim = 32, out_size = 16.
    batch, n_seq, feat, out_size = 2, 8, 4, 16
    input_dim = feat * n_seq

    key = jax.random.PRNGKey(0)
    k_state, k_params = jax.random.split(key)

    state = jax.random.normal(k_state, (batch, n_seq, feat), dtype=jnp.float32)
    params = init_params(k_params, input_dim, out_size)

    tanh_in_bf16 = _eup_has_bf16()
    out = state_projector_forward(state, params, n_seq, tanh_in_bf16=tanh_in_bf16)
    out = jax.block_until_ready(out)
    assert out.shape == (batch, out_size)

    # Tight check against a reference with the identical numeric contract.
    tanh_dtype = jnp.bfloat16 if tanh_in_bf16 else jnp.float32
    ref_matched = reference_forward(state, params, n_seq, tanh_dtype=tanh_dtype)
    assert jnp.allclose(out, ref_matched, atol=2e-3, rtol=2e-3)

    # Loose check against the full-f32-tanh reference (guards overall semantics).
    ref_f32 = reference_forward(state, params, n_seq, tanh_dtype=jnp.float32)
    assert jnp.allclose(out, ref_f32, atol=5e-2, rtol=5e-2)

    print("KERNEL_OK")
</pallas_src>

<mosaic_0001>
module attributes {stable_mosaic.version = 11 : i64} {
  func.func @_state_projector_kernel(%arg0: i32, %arg1: memref<2x32xf32, #tpu.memory_space<vmem>>, %arg2: memref<32x256xbf16, #tpu.memory_space<vmem>>, %arg3: memref<1x256xf32, #tpu.memory_space<vmem>>, %arg4: memref<256x256xbf16, #tpu.memory_space<vmem>>, %arg5: memref<1x256xf32, #tpu.memory_space<vmem>>, %arg6: memref<256x16xbf16, #tpu.memory_space<vmem>>, %arg7: memref<1x16xf32, #tpu.memory_space<vmem>>, %arg8: memref<2x16xf32, #tpu.memory_space<vmem>>) attributes {dimension_semantics = [#tpu.dimension_semantics<parallel>], iteration_bounds = array<i64: 1>, scalar_prefetch = 0 : i64, scratch_operands = 0 : i64, tpu.core_type = #tpu.core_type<tc>, window_params = [{transform_indices = @transform_0, window_bounds = array<i64: 2, 32>}, {pipeline_mode = #tpu.pipeline_mode<synchronous>, transform_indices = @transform_1, window_bounds = array<i64: 32, 256>}, {pipeline_mode = #tpu.pipeline_mode<synchronous>, transform_indices = @transform_2, window_bounds = array<i64: 1, 256>}, {pipeline_mode = #tpu.pipeline_mode<synchronous>, transform_indices = @transform_3, window_bounds = array<i64: 256, 256>}, {pipeline_mode = #tpu.pipeline_mode<synchronous>, transform_indices = @transform_4, window_bounds = array<i64: 1, 256>}, {pipeline_mode = #tpu.pipeline_mode<synchronous>, transform_indices = @transform_5, window_bounds = array<i64: 256, 16>}, {pipeline_mode = #tpu.pipeline_mode<synchronous>, transform_indices = @transform_6, window_bounds = array<i64: 1, 16>}, {transform_indices = @transform_7, window_bounds = array<i64: 2, 16>}]} {
    %c0 = arith.constant 0 : index
    %c0_0 = arith.constant 0 : index
    %0 = vector.load %arg1[%c0, %c0_0] : memref<2x32xf32, #tpu.memory_space<vmem>>, vector<2x32xf32>
    %1 = arith.truncf %0 : vector<2x32xf32> to vector<2x32xbf16>
    %c0_1 = arith.constant 0 : index
    %c0_2 = arith.constant 0 : index
    %2 = vector.load %arg2[%c0_1, %c0_2] : memref<32x256xbf16, #tpu.memory_space<vmem>>, vector<32x256xbf16>
    %cst = arith.constant dense<0.000000e+00> : vector<2x256xf32>
    %3 = tpu.matmul %1, %2, %cst {dimension_numbers = #tpu.dot_dimension_numbers<[1], [0], [0], [1], [0, 0, 1, 1], [], []>} : vector<2x32xbf16>, vector<32x256xbf16>, vector<2x256xf32> -> vector<2x256xf32>
    %c0_3 = arith.constant 0 : index
    %c0_4 = arith.constant 0 : index
    %4 = vector.load %arg3[%c0_3, %c0_4] : memref<1x256xf32, #tpu.memory_space<vmem>>, vector<1x256xf32>
    %5 = vector.broadcast %4 : vector<1x256xf32> to vector<2x256xf32>
    %6 = arith.addf %3, %5 : vector<2x256xf32>
    %7 = arith.truncf %6 : vector<2x256xf32> to vector<2x256xbf16>
    %8 = math.tanh %7 : vector<2x256xbf16>
    %c0_5 = arith.constant 0 : index
    %c0_6 = arith.constant 0 : index
    %9 = vector.load %arg4[%c0_5, %c0_6] : memref<256x256xbf16, #tpu.memory_space<vmem>>, vector<256x256xbf16>
    %cst_7 = arith.constant dense<0.000000e+00> : vector<2x256xf32>
    %10 = tpu.matmul %8, %9, %cst_7 {dimension_numbers = #tpu.dot_dimension_numbers<[1], [0], [0], [1], [0, 0, 1, 1], [], []>} : vector<2x256xbf16>, vector<256x256xbf16>, vector<2x256xf32> -> vector<2x256xf32>
    %c0_8 = arith.constant 0 : index
    %c0_9 = arith.constant 0 : index
    %11 = vector.load %arg5[%c0_8, %c0_9] : memref<1x256xf32, #tpu.memory_space<vmem>>, vector<1x256xf32>
    %12 = vector.broadcast %11 : vector<1x256xf32> to vector<2x256xf32>
    %13 = arith.addf %10, %12 : vector<2x256xf32>
    %14 = arith.truncf %13 : vector<2x256xf32> to vector<2x256xbf16>
    %15 = math.tanh %14 : vector<2x256xbf16>
    %c0_10 = arith.constant 0 : index
    %c0_11 = arith.constant 0 : index
    %16 = vector.load %arg6[%c0_10, %c0_11] : memref<256x16xbf16, #tpu.memory_space<vmem>>, vector<256x16xbf16>
    %cst_12 = arith.constant dense<0.000000e+00> : vector<2x16xf32>
    %17 = tpu.matmul %15, %16, %cst_12 {dimension_numbers = #tpu.dot_dimension_numbers<[1], [0], [0], [1], [0, 0, 1, 1], [], []>} : vector<2x256xbf16>, vector<256x16xbf16>, vector<2x16xf32> -> vector<2x16xf32>
    %c0_13 = arith.constant 0 : index
    %c0_14 = arith.constant 0 : index
    %18 = vector.load %arg7[%c0_13, %c0_14] : memref<1x16xf32, #tpu.memory_space<vmem>>, vector<1x16xf32>
    %19 = vector.broadcast %18 : vector<1x16xf32> to vector<2x16xf32>
    %20 = arith.addf %17, %19 : vector<2x16xf32>
    %c0_15 = arith.constant 0 : index
    %c0_16 = arith.constant 0 : index
    %21 = vector.load %arg8[%c0_15, %c0_16] : memref<2x16xf32, #tpu.memory_space<vmem>>, vector<2x16xf32>
    tpu.vector_store %arg8[%c0_15, %c0_16], %20 {strides = array<i32>} : memref<2x16xf32, #tpu.memory_space<vmem>>, vector<2x16xf32>,
    return
  }
  func.func @transform_0(%arg0: i32) -> (i32, i32) {
    %c0_i32 = arith.constant 0 : i32
    %c0_i32_0 = arith.constant 0 : i32
    return %arg0, %c0_i32 : i32, i32
  }
  func.func @transform_1(%arg0: i32) -> (i32, i32) {
    %c0_i32 = arith.constant 0 : i32
    %c0_i32_0 = arith.constant 0 : i32
    %c0_i32_1 = arith.constant 0 : i32
    return %c0_i32, %c0_i32_0 : i32, i32
  }
  func.func @transform_2(%arg0: i32) -> (i32, i32) {
    %c0_i32 = arith.constant 0 : i32
    %c0_i32_0 = arith.constant 0 : i32
    %c0_i32_1 = arith.constant 0 : i32
    return %c0_i32, %c0_i32_0 : i32, i32
  }
  func.func @transform_3(%arg0: i32) -> (i32, i32) {
    %c0_i32 = arith.constant 0 : i32
    %c0_i32_0 = arith.constant 0 : i32
    %c0_i32_1 = arith.constant 0 : i32
    return %c0_i32, %c0_i32_0 : i32, i32
  }
  func.func @transform_4(%arg0: i32) -> (i32, i32) {
    %c0_i32 = arith.constant 0 : i32
    %c0_i32_0 = arith.constant 0 : i32
    %c0_i32_1 = arith.constant 0 : i32
    return %c0_i32, %c0_i32_0 : i32, i32
  }
  func.func @transform_5(%arg0: i32) -> (i32, i32) {
    %c0_i32 = arith.constant 0 : i32
    %c0_i32_0 = arith.constant 0 : i32
    %c0_i32_1 = arith.constant 0 : i32
    return %c0_i32, %c0_i32_0 : i32, i32
  }
  func.func @transform_6(%arg0: i32) -> (i32, i32) {
    %c0_i32 = arith.constant 0 : i32
    %c0_i32_0 = arith.constant 0 : i32
    %c0_i32_1 = arith.constant 0 : i32
    return %c0_i32, %c0_i32_0 : i32, i32
  }
  func.func @transform_7(%arg0: i32) -> (i32, i32) {
    %c0_i32 = arith.constant 0 : i32
    %c0_i32_0 = arith.constant 0 : i32
    return %arg0, %c0_i32 : i32, i32
  }
}

</mosaic_0001>

<bundles_post_ra>
// kernel: tpu_custom_call.1
= control target key start
LH: loop header
LB: loop body
LE: loop exit
PB: predicated region body
PF: predicated region fallthrough
CT: control target
= control target key end

     0   :  { %12 = vsyncpa [#allocation3], 0  ;;  %s896_s0 = inlined_call_operand.vmem [shape: f32[2,32], index: 0, kind: input, shape index: {}]   ;;  %s897_s1 = inlined_call_operand.vmem [shape: bf16[32,256], index: 1, kind: input, shape index: {}]   ;;  %s898_s2 = inlined_call_operand.vmem [shape: f32[1,256], index: 2, kind: input, shape index: {}]   ;;  %s899_s3 = inlined_call_operand.hbm [shape: bf16[256,256], index: 3, kind: input, shape index: {}]   ;;  %s900_s4 = inlined_call_operand.vmem [shape: f32[1,256], index: 4, kind: input, shape index: {}]   ;;  %s901_s5 = inlined_call_operand.vmem [shape: bf16[256,16], index: 5, kind: input, shape index: {}]   ;;  %s902_s6 = inlined_call_operand.vmem [shape: f32[1,16], index: 6, kind: input, shape index: {}]   ;;  %s903_s7 = inlined_call_operand.hbm [shape: f32[2,16], index: 7, kind: output, shape index: {}]  }
   0x1   :  { %13 = vsyncpa [#allocation4], 0  ;;  %s773_s24 = smov [#allocation2]  }
   0x2   :  { %s25_s25 = sshll.u32 %s773_s24, 4  ;;  %s26_s25 = int_to_ptr.vmem [resolvable:$true] %s25_s25 }
   0x3   :  { %s737_s26 = scalar_lea.vmem %s26_s25, 4096  ;;  %p742_p1 = scmp.lt.s32.totalorder %s26_s25, %s26_s25 }
   0x4   :  { %p738_p0 = scmp.ne.s32.totalorder %s26_s25, %s737_s26  ;;  %p743_p2 = scmp.lt.s32.totalorder %s737_s26, %s737_s26 }
   0x6   :  { %p744_p3 = por %p743_p2, %p742_p1 }
   0x8   :  { %p745_p4 = pnand %p744_p3, %p738_p0 }
   0xa   :  { %748 = shalt.err (!%p745_p4)
}
   0xb   :  { %s774_s27 = smov 128   ;;  %s775_s28 = smov 8  }
   0xc   :  { %31 = dma.hbm_to_vmem [thread:$0]  %s899_s3, 4096, %s26_s25, [#allocation3], %s774_s27, %s774_s27, %s775_s28  }
   0xd   :  { %769 = dma.done.wait [#allocation3], 4096  }
   0xe   :  { %770 = vsyncadd [#allocation3], 4294963200  ;;  %v776_v0 = vmov 0   ;;  %v651_v1 = vld [vmem:[%s897_s1 + $0x14] ss:$8 sps:$4 sm:$0xff]   ;;  %vm80_vm0 = vcmask 261120   ;;  %v50_v44 = vlaneseq }
   0xf   :  { %116 = vmatprep.mubr.bf16.mxu0 %v776_v0  ;;  %v653_v2 = vld [vmem:[%s897_s1 + $0x10] ss:$8 sps:$4 sm:$0xff]   ;;  %96 = vmatprep.subr.bf16.mxu0 %v651_v1  ;;  %v654_v3 = vld [vmem:[%s897_s1 + $0x4] ss:$8 sps:$4 sm:$0xff]   ;;  %v656_v4 = vld [vmem:[%s897_s1] ss:$8 sps:$4 sm:$0xff]  }
  0x10   :  { %v42_v5 = vld [vmem:[%s896_s0] sm:$0x3]  ;;  %97 = vmatpush1.bf16.msra.mxu0 %v653_v2  ;;  %v657_v6 = vld [vmem:[#allocation2 + $0x74] ss:$8 sps:$4 sm:$0xff]   ;;  %v659_v7 = vld [vmem:[#allocation2 + $0x70] ss:$8 sps:$4 sm:$0xff]  }
  0x11   :  { %98 = vmatprep.subr.bf16.mxu0 %v654_v3  ;;  %333 = vmatprep.subr.bf16.mxu1 %v657_v6  ;;  %v660_v8 = vld [vmem:[#allocation2 + $0x64] ss:$8 sps:$4 sm:$0xff]   ;;  %v43_v9 = vpack.c.bf16 %v42_v5, %v42_v5  ;;  %v662_v10 = vld [vmem:[#allocation2 + $0x60] ss:$8 sps:$4 sm:$0xff]   ;;  %v663_v11 = vld [vmem:[#allocation2 + $0x54] ss:$8 sps:$4 sm:$0xff]  }
  0x12   :  { %334 = vmatpush1.bf16.msra.mxu1 %v659_v7  ;;  %v665_v12 = vld [vmem:[#allocation2 + $0x50] ss:$8 sps:$4 sm:$0xff]   ;;  %v666_v13 = vld [vmem:[#allocation2 + $0x44] ss:$8 sps:$4 sm:$0xff]   ;;  %v668_v14 = vld [vmem:[#allocation2 + $0x40] ss:$8 sps:$4 sm:$0xff]  }
  0x13   :  { %335 = vmatprep.subr.bf16.mxu1 %v660_v8  ;;  %v669_v15 = vld [vmem:[#allocation2 + $0x34] ss:$8 sps:$4 sm:$0xff]   ;;  %v671_v16 = vld [vmem:[#allocation2 + $0x30] ss:$8 sps:$4 sm:$0xff]   ;;  %v672_v17 = vld [vmem:[#allocation2 + $0x24] ss:$8 sps:$4 sm:$0xff]  }
  0x14   :  { %99 = vmatpush1.bf16.msra.mxu0 %v656_v4  ;;  %v674_v18 = vld [vmem:[#allocation2 + $0x20] ss:$8 sps:$4 sm:$0xff]   ;;  %v675_v19 = vld [vmem:[#allocation2 + $0x14] ss:$8 sps:$4 sm:$0xff]   ;;  %v677_v20 = vld [vmem:[#allocation2 + $0x10] ss:$8 sps:$4 sm:$0xff]  }
  0x15   :  { %v678_v21 = vld [vmem:[#allocation2 + $0x4] ss:$8 sps:$4 sm:$0xff]   ;;  %v680_v22 = vld [vmem:[#allocation2] ss:$8 sps:$4 sm:$0xff]   ;;  %v681_v23 = vld [vmem:[#allocation2 + $0xf4] ss:$8 sps:$4 sm:$0xff]  }
  0x16   :  { %336 = vmatpush1.bf16.msra.mxu1 %v662_v10  ;;  %v683_v24 = vld [vmem:[#allocation2 + $0xf0] ss:$8 sps:$4 sm:$0xff]   ;;  %v684_v25 = vld [vmem:[#allocation2 + $0xe4] ss:$8 sps:$4 sm:$0xff]   ;;  %v686_v26 = vld [vmem:[#allocation2 + $0xe0] ss:$8 sps:$4 sm:$0xff]  }
  0x17   :  { %574 = vmatmul.mubr.msk.bf16.vlgmr.msra.gmra.mxu0 %vm80_vm0, %v43_v9  ;;  %337 = vmatprep.subr.bf16.mxu1 %v663_v11  ;;  %v687_v27 = vld [vmem:[#allocation2 + $0xd4] ss:$8 sps:$4 sm:$0xff]   ;;  %v689_v28 = vld [vmem:[#allocation2 + $0xd0] ss:$8 sps:$4 sm:$0xff]   ;;  %v690_v29 = vld [vmem:[#allocation2 + $0xc4] ss:$8 sps:$4 sm:$0xff]  }
  0x18   :  { %v692_v30 = vld [vmem:[#allocation2 + $0xc0] ss:$8 sps:$4 sm:$0xff]   ;;  %v693_v31 = vld [vmem:[#allocation2 + $0xb4] ss:$8 sps:$4 sm:$0xff]   ;;  %v695_v32 = vld [vmem:[#allocation2 + $0xb0] ss:$8 sps:$4 sm:$0xff]  }
  0x19   :  { %v696_v33 = vld [vmem:[#allocation2 + $0xa4] ss:$8 sps:$4 sm:$0xff]   ;;  %v698_v34 = vld [vmem:[#allocation2 + $0xa0] ss:$8 sps:$4 sm:$0xff]   ;;  %v699_v35 = vld [vmem:[#allocation2 + $0x94] ss:$8 sps:$4 sm:$0xff]  }
  0x1a   :  { %338 = vmatpush1.bf16.msra.mxu1 %v665_v12  ;;  %v701_v36 = vld [vmem:[#allocation2 + $0x90] ss:$8 sps:$4 sm:$0xff]   ;;  %v702_v37 = vld [vmem:[#allocation2 + $0x84] ss:$8 sps:$4 sm:$0xff]   ;;  %v704_v38 = vld [vmem:[#allocation2 + $0x80] ss:$8 sps:$4 sm:$0xff]  }
  0x1b   :  { %339 = vmatprep.subr.bf16.mxu1 %v666_v13  ;;  %v705_v39 = vld [vmem:[%s901_s5 + $0x78] sm:$0xff]   ;;  %v707_v41 = vld [vmem:[%s901_s5 + $0x70] sm:$0xff]   ;;  %v709_v43 = vld [vmem:[%s901_s5 + $0x68] sm:$0xff]   ;;  %v51_v45 = vshrl.u32 %v50_v44, 7  ;;  %vm553_vm1 = vcmask 123904  }
  0x1c   :  { %v706_v40 = vld [vmem:[%s901_s5 + $0x38] sm:$0xff]   ;;  %624 = vmatprep.subr.bf16.mxu0 %v705_v39  ;;  %v708_v42 = vld [vmem:[%s901_s5 + $0x30] sm:$0xff]   ;;  %v48_v47 = vld [vmem:[%s898_s2] sm:$0x3] }
  0x1d   :  { %625 = vmatpush3.bf16.msra.mxu0 %v706_v40  ;;  %v52_v46 = vsub.s32 0, %v51_v45  ;;  %v56_v48 = vsub.s32 1, %v51_v45  ;;  %v710_v61 = vld [vmem:[%s901_s5 + $0x28] sm:$0xff]   ;;  %v711_v62 = vld [vmem:[%s901_s5 + $0x60] sm:$0xff]   ;;  %v713_v0 = vld [vmem:[%s901_s5 + $0x58] sm:$0xff]  }
  0x1e   :  { %340 = vmatpush1.bf16.msra.mxu1 %v668_v14  ;;  %626 = vmatprep.subr.bf16.mxu0 %v707_v41  ;;  %v712_v63 = vld [vmem:[%s901_s5 + $0x20] sm:$0xff]   ;;  %v714_v1 = vld [vmem:[%s901_s5 + $0x18] sm:$0xff]   ;;  %v715_v2 = vld [vmem:[%s901_s5 + $0x50] sm:$0xff]  }
  0x1f   :  { %341 = vmatprep.subr.bf16.mxu1 %v669_v15  ;;  %v53_v49 = vrot.slane %v48_v47, %v52_v46  ;;  %v57_v50 = vrot.slane %v48_v47, %v56_v48  ;;  %v716_v3 = vld [vmem:[%s901_s5 + $0x10] sm:$0xff]   ;;  %v717_v4 = vld [vmem:[%s901_s5 + $0x48] sm:$0xff]   ;;  %v719_v6 = vld [vmem:[%s901_s5 + $0x40] sm:$0xff]  }
  0x20   :  { %v718_v5 = vld [vmem:[%s901_s5 + $0x8] sm:$0xff]   ;;  %v720_v7 = vld [vmem:[%s901_s5] sm:$0xff]  }
  0x21   :  { %627 = vmatpush3.bf16.msra.mxu0 %v708_v42  ;;  %v161_v8 = vld [vmem:[%s900_s4] sm:$0x3]  ;;  %s777_s4 = smov [#allocation5]  }
  0x22   :  { %342 = vmatpush1.bf16.msra.mxu1 %v671_v16  ;;  %628 = vmatprep.subr.bf16.mxu0 %v709_v43  ;;  %v166_v9 = vrot.slane %v161_v8, %v52_v46  ;;  %v170_v10 = vrot.slane %v161_v8, %v56_v48  ;;  %s561_s25 = sshll.u32 %s777_s4, 4  ;;  %s562_s25 = int_to_ptr.vmem [resolvable:$true] %s561_s25 }
  0x23   :  { %343 = vmatprep.subr.bf16.mxu1 %v672_v17  ;;  %s749_s26 = scalar_lea.vmem %s562_s25, 32  ;;  %p754_p6 = scmp.lt.s32.totalorder %s562_s25, %s562_s25 }
  0x24   :  { %p750_p5 = scmp.ne.s32.totalorder %s562_s25, %s749_s26  ;;  %p755_p7 = scmp.lt.s32.totalorder %s749_s26, %s749_s26 }
  0x25   :  { %629 = vmatpush3.bf16.msra.mxu0 %v710_v61 }
  0x26   :  { %344 = vmatpush1.bf16.msra.mxu1 %v674_v18  ;;  %630 = vmatprep.subr.bf16.mxu0 %v711_v62  ;;  %p756_p8 = por %p755_p7, %p754_p6 }
  0x27   :  { %345 = vmatprep.subr.bf16.mxu1 %v675_v19 }
  0x28   :  { %p757_p9 = pnand %p756_p8, %p750_p5 }
  0x29   :  { %631 = vmatpush3.bf16.msra.mxu0 %v712_v63 }
  0x2a   :  { %346 = vmatpush1.bf16.msra.mxu1 %v677_v20  ;;  %632 = vmatprep.subr.bf16.mxu0 %v713_v0 }
  0x2b   :  { %347 = vmatprep.subr.bf16.mxu1 %v678_v21 }
  0x2d   :  { %633 = vmatpush3.bf16.msra.mxu0 %v714_v1 }
  0x2e   :  { %348 = vmatpush1.bf16.msra.mxu1 %v680_v22  ;;  %634 = vmatprep.subr.bf16.mxu0 %v715_v2  ;;  %v607_v22 = vld [vmem:[%s902_s6] ss:$0 sm:$0xff] }
  0x2f   :  { %349 = vmatprep.subr.bf16.mxu1 %v681_v23 }
  0x31   :  { %635 = vmatpush3.bf16.msra.mxu0 %v716_v3 }
  0x32   :  { %350 = vmatpush2.bf16.msra.mxu1 %v683_v24  ;;  %636 = vmatprep.subr.bf16.mxu0 %v717_v4 }
  0x33   :  { %351 = vmatprep.subr.bf16.mxu1 %v684_v25 }
  0x35   :  { %637 = vmatpush3.bf16.msra.mxu0 %v718_v5 }
  0x36   :  { %352 = vmatpush2.bf16.msra.mxu1 %v686_v26  ;;  %638 = vmatprep.subr.bf16.mxu0 %v719_v6 }
  0x37   :  { %353 = vmatprep.subr.bf16.mxu1 %v687_v27 }
  0x39   :  { %639 = vmatpush3.bf16.msra.mxu0 %v720_v7 }
  0x3a   :  { %354 = vmatpush2.bf16.msra.mxu1 %v689_v28 }
  0x3b   :  { %355 = vmatprep.subr.bf16.mxu1 %v690_v29 }
  0x3e   :  { %356 = vmatpush2.bf16.msra.mxu1 %v692_v30 }
  0x3f   :  { %357 = vmatprep.subr.bf16.mxu1 %v693_v31 }
  0x42   :  { %358 = vmatpush2.bf16.msra.mxu1 %v695_v32 }
  0x43   :  { %359 = vmatprep.subr.bf16.mxu1 %v696_v33 }
  0x46   :  { %360 = vmatpush2.bf16.msra.mxu1 %v698_v34 }
  0x47   :  { %361 = vmatprep.subr.bf16.mxu1 %v699_v35 }
  0x4a   :  { %362 = vmatpush2.bf16.msra.mxu1 %v701_v36 }
  0x4b   :  { %363 = vmatprep.subr.bf16.mxu1 %v702_v37 }
  0x4e   :  { %364 = vmatpush2.bf16.msra.mxu1 %v704_v38 }
  0xd7   :  { %v118_v51 = vpop.f32.mrf.mxu0 }
  0xd8   :  { %v119_v52 = vadd.f32 %v118_v51, %v53_v49 }
  0xd9   :  { %v120_v53 = vpop.f32.mrf.mxu0 }
  0xda   :  { %v121_v54 = vadd.f32 %v120_v53, %v57_v50  ;;  %v125_v55 = vpack.c.bf16 %v119_v52, %v119_v52 }
  0xdb   :  { %v122_v56 = vpop.f32.mrf.mxu0 }
  0xdc   :  { %v126_v57 = vpack.c.bf16 %v121_v54, %v121_v54 }
  0xdd   :  { %v123_v58 = vpop.f32.mrf.mxu0 }
  0xde   :  { %721 = vtanh.bf16 %v126_v57 }
  0xdf   :  { %723 = vtanh.bf16 %v125_v55 }
  0xec   :  { %v722_v59 = vpop.eup %721 }
  0xed   :  { %v724_v60 = vpop.eup %723  ;;  %365 = vmatprep.mubr.bf16.mxu1 %v722_v59 }
  0xee   :  { %366 = vmatmul.mubr.bf16.vlgmr.msra.gmra.mxu1 %v724_v60 }
 0x1ae   :  { %v367_v11 = vpop.f32.mrf.mxu1 }
 0x1af   :  { %v368_v12 = vadd.f32 %v367_v11, %v166_v9 }
 0x1b0   :  { %v369_v13 = vpop.f32.mrf.mxu1 }
 0x1b1   :  { %v370_v14 = vadd.f32 %v369_v13, %v170_v10  ;;  %v374_v15 = vpack.c.bf16 %v368_v12, %v368_v12 }
 0x1b2   :  { %v371_v16 = vpop.f32.mrf.mxu1 }
 0x1b3   :  { %v375_v17 = vpack.c.bf16 %v370_v14, %v370_v14 }
 0x1b4   :  { %v372_v18 = vpop.f32.mrf.mxu1 }
 0x1b5   :  { %725 = vtanh.bf16 %v375_v17 }
 0x1b6   :  { %727 = vtanh.bf16 %v374_v15 }
 0x1c3   :  { %v726_v19 = vpop.eup %725 }
 0x1c4   :  { %v728_v20 = vpop.eup %727  ;;  %545 = vmatprep.mubr.bf16.mxu0 %v726_v19 }
 0x1c5   :  { %546 = vmatmul.mubr.bf16.vlgmr.msra.gmra.mxu0 %v728_v20 }
 0x285   :  { %v640_v21 = vpop.f32.mrf.mxu0 }
 0x287   :  { %v641_v23 = vpop.f32.mrf.mxu0 }
 0x288   :  { %v642_v24 = vadd.f32 %v641_v23, %v640_v21 }
 0x289   :  { %v643_v25 = vpop.f32.mrf.mxu0 }
 0x28a   :  { %v548_v26 = vadd.f32 %v642_v24, %v607_v22 }
 0x28b   :  { %v644_v27 = vpop.f32.mrf.mxu0 }
 0x28c   :  { %554 = vst.msk [vmem:[#allocation5] sm:$0x3] %vm553_vm1, %v548_v26 }
 0x28d   :  { %760 = shalt.err (!%p757_p9)
}
 0x28e   :  { %564 = dma.vmem_to_hbm [thread:$0]  %s562_s25, 32, %s903_s7, [#allocation4]  }
 0x28f   :  { %771 = dma.done.wait [#allocation4], 32  }
 0x290   :  { %772 = vsyncadd [#allocation4], 4294967264 }
 0x291   :  { %568 = vsyncpa [#allocation3], 1 }
 0x292   :  { %569 = vsyncpa [#allocation4], 1 }

</bundles_post_ra>
